<compile_context>
chip_gen: v5e
topology: v5e:2x2
jax: 0.10.0
libtpu: 0.0.40
codegen_flags: <defaults>
</compile_context>

<pallas_src>
import functools

import jax
import jax.numpy as jnp
from jax.experimental import pallas as pl
from jax.experimental.pallas import tpu as pltpu


def _actnorm_kernel(x_ref, mask_ref, scale_ref, bias_ref, y_ref, *,
                    compute_dtype):
    scale = scale_ref[...]                        # (1, C, 1), compute_dtype
    bias = bias_ref[...]                          # (1, C, 1), compute_dtype
    x = x_ref[...].astype(compute_dtype)          # (b_blk, C, tile_t)
    mask = mask_ref[...].astype(compute_dtype)    # (b_blk, 1, tile_t)
    y_ref[...] = ((bias + scale * x) * mask).astype(y_ref.dtype)


def _pick_tile_t(T_pad, max_tile=2048):
    """Largest multiple-of-128 divisor of T_pad that is <= max_tile."""
    t = min(T_pad, max_tile)
    t -= t % 128
    t = max(t, 128)
    while T_pad % t != 0:
        t -= 128
    return t


def _pick_b_blk(B, C, tile_t, itemsize, max_block_bytes):
    """Largest divisor of B keeping the x block under max_block_bytes."""
    per_batch = C * tile_t * itemsize
    target = max(1, max_block_bytes // per_batch)
    b = int(min(B, target))
    while B % b != 0:
        b -= 1
    return b


def actnorm_forward(x, x_mask, logs, bias, *, tile_t=None, b_blk=None,
                    compute_dtype=jnp.float32, max_block_bytes=2 << 20):
    """Forward pass of an (already initialized) ActNorm module.

    x:      (B, C, T)
    x_mask: (B, 1, T)
    logs:   (1, C, 1)  (PyTorch parameter shape)
    bias:   (1, C, 1)
    Returns (y, logdet) with y.shape == x.shape, logdet.shape == (B,).
    """
    B, C, T = x.shape
    x_itemsize = jnp.dtype(x.dtype).itemsize
    m_itemsize = jnp.dtype(x_mask.dtype).itemsize

    # Hoist exp(logs) out of the kernel; (C,)-sized op, not a tensor pre-scale.
    scale3 = jnp.exp(logs.astype(jnp.float32)).reshape(1, C, 1).astype(compute_dtype)
    bias3 = bias.astype(jnp.float32).reshape(1, C, 1).astype(compute_dtype)

    # Pad time up to a multiple of 128 so all loads/stores are lane-dense.
    T_pad = ((T + 127) // 128) * 128
    if T_pad != T:
        pad = T_pad - T
        x_p = jnp.pad(x, ((0, 0), (0, 0), (0, pad)))
        mask_p = jnp.pad(x_mask, ((0, 0), (0, 0), (0, pad)))
    else:
        x_p, mask_p = x, x_mask

    if tile_t is None:
        tile_t = _pick_tile_t(T_pad)
    assert T_pad % tile_t == 0 and tile_t % 128 == 0, "bad tile_t"
    n_t = T_pad // tile_t

    if b_blk is None:
        b_blk = _pick_b_blk(B, C, tile_t, x_itemsize, max_block_bytes)
    assert B % b_blk == 0, "b_blk must divide B"
    n_b = B // b_blk

    grid_spec = pltpu.PrefetchScalarGridSpec(
        num_scalar_prefetch=0,
        grid=(n_b, n_t),
        in_specs=[
            pl.BlockSpec((b_blk, C, tile_t), lambda b, t: (b, 0, t)),  # x
            pl.BlockSpec((b_blk, 1, tile_t), lambda b, t: (b, 0, t)),  # mask
            pl.BlockSpec((1, C, 1), lambda b, t: (0, 0, 0)),           # scale
            pl.BlockSpec((1, C, 1), lambda b, t: (0, 0, 0)),           # bias
        ],
        out_specs=pl.BlockSpec((b_blk, C, tile_t), lambda b, t: (b, 0, t)),
    )

    cost = pl.CostEstimate(
        flops=3 * B * C * T_pad,
        transcendentals=0,
        bytes_accessed=(2 * B * C * T_pad * x_itemsize   # x read + y write
                        + B * T_pad * m_itemsize         # mask read
                        + 2 * C * jnp.dtype(compute_dtype).itemsize),
    )

    y_p = pl.pallas_call(
        functools.partial(_actnorm_kernel, compute_dtype=compute_dtype),
        out_shape=jax.ShapeDtypeStruct((B, C, T_pad), x.dtype),
        grid_spec=grid_spec,
        compiler_params=pltpu.CompilerParams(
            # No cross-iteration accumulator -> both axes independent; lets
            # v7x shard the grid across its two TensorCores.
            dimension_semantics=("parallel", "parallel"),
            vmem_limit_bytes=32 * 1024 * 1024,
        ),
        cost_estimate=cost,
    )(x_p, mask_p, scale3, bias3)

    y = y_p[:, :, :T] if T_pad != T else y_p

    # logdet = sum(logs) * x_len; tiny (B,)-sized reduction, kept in f32 in the
    # wrapper so the batch grid axis can be megacore-parallel (see review).
    logdet = (jnp.sum(logs.astype(jnp.float32))
              * jnp.sum(x_mask.astype(jnp.float32), axis=(1, 2)))
    return y, logdet


def actnorm_init_params(x, x_mask):
    """Pure-JAX mirror of ActNorm.initialize_parameters (first-batch stats)."""
    C = x.shape[1]
    denom = jnp.sum(x_mask, axis=(0, 2))                       # (1,)
    m = jnp.sum(x * x_mask, axis=(0, 2)) / denom               # (C,)
    m_sq = jnp.sum(x * x * x_mask, axis=(0, 2)) / denom        # (C,)
    v = m_sq - m ** 2
    logs_stat = 0.5 * jnp.log(jnp.maximum(v, 1e-6))
    bias = (-m * jnp.exp(-logs_stat)).reshape(1, C, 1)
    logs = (-logs_stat).reshape(1, C, 1)
    return logs.astype(jnp.float32), bias.astype(jnp.float32)


def ref_forward(x, x_mask, logs, bias):
    """Plain-JAX reference mirroring the PyTorch module's forward()."""
    y = (bias + jnp.exp(logs) * x) * x_mask
    logdet = jnp.sum(logs) * jnp.sum(x_mask, axis=(1, 2))
    return y, logdet


def _make_inputs(key, B, C, T):
    kx, kl = jax.random.split(key)
    x = jax.random.normal(kx, (B, C, T), jnp.float32)
    lengths = T - jax.random.randint(kl, (B,), 0, max(1, T // 2))
    positions = jnp.arange(T, dtype=jnp.int32)
    x_mask = (positions[None, None, :] < lengths[:, None, None]).astype(jnp.float32)
    return x, x_mask


def _check(x, x_mask, logs, bias, **kw):
    y, logdet = actnorm_forward(x, x_mask, logs, bias, **kw)
    jax.block_until_ready((y, logdet))
    y_ref, logdet_ref = ref_forward(x, x_mask, logs, bias)
    assert y.shape == x.shape and logdet.shape == (x.shape[0],)
    assert jnp.allclose(y, y_ref, rtol=1e-5, atol=1e-5)
    assert jnp.allclose(logdet, logdet_ref, rtol=1e-4, atol=1e-4)


if __name__ == "__main__":
    key = jax.random.PRNGKey(0)
    k1, k2 = jax.random.split(key)

    # Module default num_channels=16; lane-dense T.
    B, C, T = 4, 16, 384
    x, x_mask = _make_inputs(k1, B, C, T)
    # Emulate ActNorm's first-call data-dependent initialization.
    logs, bias = actnorm_init_params(x, x_mask)

    # 1) Auto config: batch+time blocked into one ~1 MiB-class tile.
    _check(x, x_mask, logs, bias)

    # 2) Forced small tiles: exercises the multi-step grid (2 x 3 grid).
    _check(x, x_mask, logs, bias, tile_t=128, b_blk=2)

    # 3) Ragged T (not a multiple of 128): exercises the lane-padding path.
    Br, Tr = 2, 200
    xr, mr = _make_inputs(k2, Br, C, Tr)
    logs_r, bias_r = actnorm_init_params(xr, mr)
    _check(xr, mr, logs_r, bias_r)

    print("KERNEL_OK")
</pallas_src>

<mosaic_0001>
module attributes {stable_mosaic.version = 11 : i64} {
  func.func @_actnorm_kernel(%arg0: i32, %arg1: i32, %arg2: memref<4x16x384xf32, #tpu.memory_space<vmem>>, %arg3: memref<4x1x384xf32, #tpu.memory_space<vmem>>, %arg4: memref<1x16x1xf32, #tpu.memory_space<vmem>>, %arg5: memref<1x16x1xf32, #tpu.memory_space<vmem>>, %arg6: memref<4x16x384xf32, #tpu.memory_space<vmem>>) attributes {dimension_semantics = [#tpu.dimension_semantics<parallel>, #tpu.dimension_semantics<parallel>], iteration_bounds = array<i64: 1, 1>, scalar_prefetch = 0 : i64, scratch_operands = 0 : i64, tpu.core_type = #tpu.core_type<tc>, window_params = [{transform_indices = @transform_0, window_bounds = array<i64: 4, 16, 384>}, {transform_indices = @transform_1, window_bounds = array<i64: 4, 1, 384>}, {pipeline_mode = #tpu.pipeline_mode<synchronous>, transform_indices = @transform_2, window_bounds = array<i64: 1, 16, 1>}, {pipeline_mode = #tpu.pipeline_mode<synchronous>, transform_indices = @transform_3, window_bounds = array<i64: 1, 16, 1>}, {transform_indices = @transform_4, window_bounds = array<i64: 4, 16, 384>}]} {
    %c0 = arith.constant 0 : index
    %c0_0 = arith.constant 0 : index
    %c0_1 = arith.constant 0 : index
    %0 = vector.load %arg4[%c0, %c0_0, %c0_1] : memref<1x16x1xf32, #tpu.memory_space<vmem>>, vector<1x16x1xf32>
    %c0_2 = arith.constant 0 : index
    %c0_3 = arith.constant 0 : index
    %c0_4 = arith.constant 0 : index
    %1 = vector.load %arg5[%c0_2, %c0_3, %c0_4] : memref<1x16x1xf32, #tpu.memory_space<vmem>>, vector<1x16x1xf32>
    %c0_5 = arith.constant 0 : index
    %c0_6 = arith.constant 0 : index
    %c0_7 = arith.constant 0 : index
    %2 = vector.load %arg2[%c0_5, %c0_6, %c0_7] : memref<4x16x384xf32, #tpu.memory_space<vmem>>, vector<4x16x384xf32>
    %c0_8 = arith.constant 0 : index
    %c0_9 = arith.constant 0 : index
    %c0_10 = arith.constant 0 : index
    %3 = vector.load %arg3[%c0_8, %c0_9, %c0_10] : memref<4x1x384xf32, #tpu.memory_space<vmem>>, vector<4x1x384xf32>
    %4 = vector.broadcast %0 : vector<1x16x1xf32> to vector<4x16x384xf32>
    %5 = arith.mulf %4, %2 : vector<4x16x384xf32>
    %6 = vector.broadcast %1 : vector<1x16x1xf32> to vector<4x16x384xf32>
    %7 = arith.addf %6, %5 : vector<4x16x384xf32>
    %8 = vector.broadcast %3 : vector<4x1x384xf32> to vector<4x16x384xf32>
    %9 = arith.mulf %7, %8 : vector<4x16x384xf32>
    %c0_11 = arith.constant 0 : index
    %c0_12 = arith.constant 0 : index
    %c0_13 = arith.constant 0 : index
    %10 = vector.load %arg6[%c0_11, %c0_12, %c0_13] : memref<4x16x384xf32, #tpu.memory_space<vmem>>, vector<4x16x384xf32>
    tpu.vector_store %arg6[%c0_11, %c0_12, %c0_13], %9 {strides = array<i32>} : memref<4x16x384xf32, #tpu.memory_space<vmem>>, vector<4x16x384xf32>,
    return
  }
  func.func @transform_0(%arg0: i32, %arg1: i32) -> (i32, i32, i32) {
    %c0_i32 = arith.constant 0 : i32
    %c0_i32_0 = arith.constant 0 : i32
    return %arg0, %c0_i32, %arg1 : i32, i32, i32
  }
  func.func @transform_1(%arg0: i32, %arg1: i32) -> (i32, i32, i32) {
    %c0_i32 = arith.constant 0 : i32
    %c0_i32_0 = arith.constant 0 : i32
    return %arg0, %c0_i32, %arg1 : i32, i32, i32
  }
  func.func @transform_2(%arg0: i32, %arg1: i32) -> (i32, i32, i32) {
    %c0_i32 = arith.constant 0 : i32
    %c0_i32_0 = arith.constant 0 : i32
    %c0_i32_1 = arith.constant 0 : i32
    %c0_i32_2 = arith.constant 0 : i32
    return %c0_i32, %c0_i32_0, %c0_i32_1 : i32, i32, i32
  }
  func.func @transform_3(%arg0: i32, %arg1: i32) -> (i32, i32, i32) {
    %c0_i32 = arith.constant 0 : i32
    %c0_i32_0 = arith.constant 0 : i32
    %c0_i32_1 = arith.constant 0 : i32
    %c0_i32_2 = arith.constant 0 : i32
    return %c0_i32, %c0_i32_0, %c0_i32_1 : i32, i32, i32
  }
  func.func @transform_4(%arg0: i32, %arg1: i32) -> (i32, i32, i32) {
    %c0_i32 = arith.constant 0 : i32
    %c0_i32_0 = arith.constant 0 : i32
    return %arg0, %c0_i32, %arg1 : i32, i32, i32
  }
}

</mosaic_0001>

<bundles_post_ra>
// kernel: tpu_custom_call.1
= control target key start
LH: loop header
LB: loop body
LE: loop exit
PB: predicated region body
PF: predicated region fallthrough
CT: control target
= control target key end

     0   :  { %9 = vsyncpa [#allocation3], 0  ;;  %s418_s0 = inlined_call_operand.hbm [shape: f32[4,16,384], index: 0, kind: input, shape index: {}]   ;;  %s419_s1 = inlined_call_operand.vmem [shape: f32[4,1,384], index: 1, kind: input, shape index: {}]   ;;  %s420_s2 = inlined_call_operand.vmem [shape: f32[1,16,1], index: 2, kind: input, shape index: {}]   ;;  %s421_s3 = inlined_call_operand.vmem [shape: f32[1,16,1], index: 3, kind: input, shape index: {}]   ;;  %s422_s4 = inlined_call_operand.hbm [shape: f32[4,16,384], index: 4, kind: output, shape index: {}]  }
   0x1   :  { %10 = vsyncpa [#allocation4], 0  ;;  %s15_s17 = sshll.u32 %s418_s0, 4  ;;  %s288_s18 = smov [#allocation2]   ;;  %s16_s17 = int_to_ptr.hbm [resolvable:$true] %s15_s17 }
   0x2   :  { %s17_s19 = sshll.u32 %s288_s18, 4  ;;  %s289_s20 = smov 384   ;;  %s18_s19 = int_to_ptr.vmem [resolvable:$true] %s17_s19 }
   0x3   :  { %s290_s21 = smov 24  }
   0x4   :  { %23 = dma.hbm_to_vmem [thread:$0]  %s16_s17, 3072, %s18_s19, [#allocation3], %s289_s20, %s289_s20, %s290_s21  }
   0x5   :  { %284 = dma.done.wait [#allocation3], 3072  }
   0x6   :  { %285 = vsyncadd [#allocation3], 4294964224  ;;  %v291_v0 = vmov 0   ;;  %v36_v1 = vld [vmem:[%s421_s3] sm:$0xff]  ;;  %v37_v3 = vld [vmem:[%s421_s3 + $0x8] sm:$0xff]  ;;  %s216_s12 = sshll.u32 %s422_s4, 4  ;;  %s217_s12 = int_to_ptr.hbm [resolvable:$true] %s216_s12 }
   0x7   :  { %235 = vset.pattern.permute.xlu1 %v291_v0  ;;  %234 = vset.pattern.permute.xlu0 %v291_v0  ;;  %v34_v2 = vld [vmem:[%s420_s2] sm:$0xff]  ;;  %v35_v4 = vld [vmem:[%s420_s2 + $0x8] sm:$0xff]  ;;  %v40_v7 = vld [vmem:[#allocation2 + $0x10] sm:$0xff] }
   0x8   :  { %102 = vperm.xlu1 %235, %v36_v1   ;;  %68 = vperm.xlu0 %234, %v34_v2   ;;  %v38_v5 = vld [vmem:[#allocation2] sm:$0xff]  ;;  %v39_v6 = vld [vmem:[#allocation2 + $0x8] sm:$0xff]  ;;  %v44_v8 = vld [vmem:[#allocation2 + $0x30] sm:$0xff] }
   0x9   :  { %v45_v9 = vld [vmem:[#allocation2 + $0x38] sm:$0xff]  ;;  %v46_v10 = vld [vmem:[#allocation2 + $0x40] sm:$0xff]  ;;  %v51_v13 = vld [vmem:[#allocation2 + $0x68] sm:$0xff] }
   0xa   :  { %v339_v11 = vld [vmem:[%s419_s1] sm:$0x7]  ;;  %v344_v15 = vld [vmem:[%s419_s1 + $0x3] sm:$0x7]  ;;  %v52_v21 = vld [vmem:[#allocation2 + $0x70] sm:$0xff] }
   0xb   :  { %v50_v12 = vld [vmem:[#allocation2 + $0x60] sm:$0xff]  ;;  %v138_v24 = vperm.slane %v339_v11, 0  ;;  %v139_v25 = vperm.slane %v339_v11, 1  ;;  %v56_v26 = vld [vmem:[#allocation2 + $0x90] sm:$0xff]  ;;  %v57_v27 = vld [vmem:[#allocation2 + $0x98] sm:$0xff]  ;;  %v140_v31 = vperm.slane %v339_v11, 2 }
   0xc   :  { %v351_v30 = vld [vmem:[%s419_s1 + $0x6] sm:$0x7]  ;;  %v141_v32 = vperm.slane %v344_v15, 0  ;;  %v142_v40 = vperm.slane %v344_v15, 1  ;;  %v143_v41 = vperm.slane %v344_v15, 2  ;;  %v41_v48 = vld [vmem:[#allocation2 + $0x18] sm:$0xff] }
   0xd   :  { %v58_v37 = vld [vmem:[#allocation2 + $0xa0] sm:$0xff]  ;;  %v360_v45 = vld [vmem:[%s419_s1 + $0x9] sm:$0x7]  ;;  %v144_v46 = vperm.slane %v351_v30, 0  ;;  %v145_v56 = vperm.slane %v351_v30, 1  ;;  %v146_v61 = vperm.slane %v351_v30, 2 }
   0xe   :  { %v42_v49 = vld [vmem:[#allocation2 + $0x20] sm:$0xff]  ;;  %v43_v55 = vld [vmem:[#allocation2 + $0x28] sm:$0xff]  ;;  %v147_v62 = vperm.slane %v360_v45, 0  ;;  %v48_v1 = vld [vmem:[#allocation2 + $0x50] sm:$0xff]  ;;  %s292_s1 = smov [#allocation5]  }
   0xf   :  { %v47_v60 = vld [vmem:[#allocation2 + $0x48] sm:$0xff]  ;;  %s214_s9 = sshll.u32 %s292_s1, 4  ;;  %s215_s9 = int_to_ptr.vmem [resolvable:$true] %s214_s9 }
  0x10   :  { %107 = vperm.xlu1 %235, %v37_v3   ;;  %73 = vperm.xlu0 %234, %v35_v4  }
  0x7a   :  { %v69_v14 = vpop.permute.xlu0 %68  ;;  %v103_v20 = vpop.permute.xlu1 %102 }
  0x7b   :  { %v76_v16 = vmul.f32 %v69_v14, %v38_v5  ;;  %v77_v17 = vmul.f32 %v69_v14, %v39_v6  ;;  %v78_v18 = vmul.f32 %v69_v14, %v40_v7  ;;  %v82_v19 = vmul.f32 %v69_v14, %v44_v8  ;;  %v49_v6 = vld [vmem:[#allocation2 + $0x58] sm:$0xff] }
  0x7c   :  { %v83_v22 = vmul.f32 %v69_v14, %v45_v9  ;;  %v84_v23 = vmul.f32 %v69_v14, %v46_v10  ;;  %v88_v28 = vmul.f32 %v69_v14, %v50_v12  ;;  %v89_v29 = vmul.f32 %v69_v14, %v51_v13  ;;  %v53_v13 = vld [vmem:[#allocation2 + $0x78] sm:$0xff] }
  0x7d   :  { %v110_v33 = vadd.f32 %v103_v20, %v76_v16  ;;  %v111_v34 = vadd.f32 %v103_v20, %v77_v17  ;;  %v112_v35 = vadd.f32 %v103_v20, %v78_v18  ;;  %v116_v36 = vadd.f32 %v103_v20, %v82_v19  ;;  %v54_v18 = vld [vmem:[#allocation2 + $0x80] sm:$0xff] }
  0x7e   :  { %v90_v38 = vmul.f32 %v69_v14, %v52_v21  ;;  %v117_v39 = vadd.f32 %v103_v20, %v83_v22  ;;  %v94_v42 = vmul.f32 %v69_v14, %v56_v26  ;;  %v95_v43 = vmul.f32 %v69_v14, %v57_v27 }
  0x7f   :  { %v118_v44 = vadd.f32 %v103_v20, %v84_v23  ;;  %v122_v47 = vadd.f32 %v103_v20, %v88_v28  ;;  %v162_v50 = vmul.f32 %v138_v24, %v110_v33  ;;  %v163_v51 = vmul.f32 %v139_v25, %v111_v34  ;;  %v55_v23 = vld [vmem:[#allocation2 + $0x88] sm:$0xff] }
  0x80   :  { %v164_v52 = vmul.f32 %v140_v31, %v112_v35  ;;  %v96_v53 = vmul.f32 %v69_v14, %v58_v37  ;;  %v123_v54 = vadd.f32 %v103_v20, %v89_v29  ;;  %v168_v57 = vmul.f32 %v141_v32, %v116_v36  ;;  %v59_v28 = vld [vmem:[#allocation2 + $0xa8] sm:$0xff]  ;;  %v60_v35 = vld [vmem:[#allocation2 + $0xb0] sm:$0xff] }
  0x81   :  { %v124_v59 = vadd.f32 %v103_v20, %v90_v38  ;;  %v169_v63 = vmul.f32 %v142_v40, %v117_v39  ;;  %186 = vst [vmem:[#allocation5] sm:$0xff] %v162_v50  ;;  %v128_v0 = vadd.f32 %v103_v20, %v94_v42  ;;  %v170_v2 = vmul.f32 %v143_v41, %v118_v44  ;;  %v61_v39 = vld [vmem:[#allocation2 + $0xb8] sm:$0xff] }
  0x82   :  { %v74_v58 = vpop.permute.xlu0 %73  ;;  %187 = vst [vmem:[#allocation5 + $0x8] sm:$0xff] %v163_v51  ;;  %v129_v5 = vadd.f32 %v103_v20, %v95_v43  ;;  %v148_v7 = vperm.slane %v360_v45, 1  ;;  %v174_v8 = vmul.f32 %v144_v46, %v122_v47  ;;  %v130_v10 = vadd.f32 %v103_v20, %v96_v53  ;;  %v108_v12 = vpop.permute.xlu1 %107 }
  0x83   :  { %v79_v3 = vmul.f32 %v74_v58, %v41_v48  ;;  %v80_v4 = vmul.f32 %v74_v58, %v42_v49  ;;  %188 = vst [vmem:[#allocation5 + $0x10] sm:$0xff] %v164_v52  ;;  %v81_v9 = vmul.f32 %v74_v58, %v43_v55  ;;  %v149_v14 = vperm.slane %v360_v45, 2 }
  0x84   :  { %v175_v16 = vmul.f32 %v145_v56, %v123_v54  ;;  %192 = vst [vmem:[#allocation5 + $0x30] sm:$0xff] %v168_v57  ;;  %v85_v17 = vmul.f32 %v74_v58, %v47_v60  ;;  %v176_v19 = vmul.f32 %v146_v61, %v124_v59  ;;  %v86_v21 = vmul.f32 %v74_v58, %v48_v1 }
  0x85   :  { %193 = vst [vmem:[#allocation5 + $0x38] sm:$0xff] %v169_v63  ;;  %v113_v22 = vadd.f32 %v108_v12, %v79_v3  ;;  %v180_v20 = vmul.f32 %v147_v62, %v128_v0  ;;  %v87_v26 = vmul.f32 %v74_v58, %v49_v6  ;;  %v114_v27 = vadd.f32 %v108_v12, %v80_v4 }
  0x86   :  { %194 = vst [vmem:[#allocation5 + $0x40] sm:$0xff] %v170_v2  ;;  %v181_v29 = vmul.f32 %v148_v7, %v129_v5  ;;  %v91_v33 = vmul.f32 %v74_v58, %v53_v13  ;;  %v115_v34 = vadd.f32 %v108_v12, %v81_v9  ;;  %v182_v36 = vmul.f32 %v149_v14, %v130_v10 }
  0x87   :  { %198 = vst [vmem:[#allocation5 + $0x60] sm:$0xff] %v174_v8  ;;  %v92_v37 = vmul.f32 %v74_v58, %v54_v18  ;;  %v119_v38 = vadd.f32 %v108_v12, %v85_v17  ;;  %v93_v42 = vmul.f32 %v74_v58, %v55_v23  ;;  %v120_v43 = vadd.f32 %v108_v12, %v86_v21 }
  0x88   :  { %199 = vst [vmem:[#allocation5 + $0x68] sm:$0xff] %v175_v16  ;;  %v165_v44 = vmul.f32 %v138_v24, %v113_v22  ;;  %v97_v47 = vmul.f32 %v74_v58, %v59_v28  ;;  %v121_v48 = vadd.f32 %v108_v12, %v87_v26  ;;  %v166_v49 = vmul.f32 %v139_v25, %v114_v27 }
  0x89   :  { %200 = vst [vmem:[#allocation5 + $0x70] sm:$0xff] %v176_v19  ;;  %v98_v50 = vmul.f32 %v74_v58, %v60_v35  ;;  %v125_v51 = vadd.f32 %v108_v12, %v91_v33  ;;  %v167_v52 = vmul.f32 %v140_v31, %v115_v34  ;;  %v99_v53 = vmul.f32 %v74_v58, %v61_v39 }
  0x8a   :  { %204 = vst [vmem:[#allocation5 + $0x90] sm:$0xff] %v180_v20  ;;  %v126_v54 = vadd.f32 %v108_v12, %v92_v37  ;;  %v171_v55 = vmul.f32 %v141_v32, %v119_v38  ;;  %v127_v57 = vadd.f32 %v108_v12, %v93_v42  ;;  %v172_v24 = vmul.f32 %v142_v40, %v120_v43 }
  0x8b   :  { %205 = vst [vmem:[#allocation5 + $0x98] sm:$0xff] %v181_v29  ;;  %v131_v59 = vadd.f32 %v108_v12, %v97_v47  ;;  %v173_v25 = vmul.f32 %v143_v41, %v121_v48  ;;  %v132_v60 = vadd.f32 %v108_v12, %v98_v50  ;;  %v177_v11 = vmul.f32 %v144_v46, %v125_v51 }
  0x8c   :  { %206 = vst [vmem:[#allocation5 + $0xa0] sm:$0xff] %v182_v36  ;;  %v133_v31 = vadd.f32 %v108_v12, %v99_v53  ;;  %v178_v58 = vmul.f32 %v145_v56, %v126_v54  ;;  %v179_v32 = vmul.f32 %v146_v61, %v127_v57 }
  0x8d   :  { %189 = vst [vmem:[#allocation5 + $0x18] sm:$0xff] %v165_v44  ;;  %v183_v40 = vmul.f32 %v147_v62, %v131_v59  ;;  %v184_v15 = vmul.f32 %v148_v7, %v132_v60 }
  0x8e   :  { %190 = vst [vmem:[#allocation5 + $0x20] sm:$0xff] %v166_v49  ;;  %v185_v41 = vmul.f32 %v149_v14, %v133_v31 }
  0x8f   :  { %191 = vst [vmem:[#allocation5 + $0x28] sm:$0xff] %v167_v52 }
  0x90   :  { %195 = vst [vmem:[#allocation5 + $0x48] sm:$0xff] %v171_v55 }
  0x91   :  { %196 = vst [vmem:[#allocation5 + $0x50] sm:$0xff] %v172_v24 }
  0x92   :  { %197 = vst [vmem:[#allocation5 + $0x58] sm:$0xff] %v173_v25 }
  0x93   :  { %201 = vst [vmem:[#allocation5 + $0x78] sm:$0xff] %v177_v11 }
  0x94   :  { %202 = vst [vmem:[#allocation5 + $0x80] sm:$0xff] %v178_v58 }
  0x95   :  { %203 = vst [vmem:[#allocation5 + $0x88] sm:$0xff] %v179_v32 }
  0x96   :  { %207 = vst [vmem:[#allocation5 + $0xa8] sm:$0xff] %v183_v40 }
  0x97   :  { %208 = vst [vmem:[#allocation5 + $0xb0] sm:$0xff] %v184_v15 }
  0x98   :  { %209 = vst [vmem:[#allocation5 + $0xb8] sm:$0xff] %v185_v41 }
  0x99   :  { %222 = dma.vmem_to_hbm [thread:$0]  %s215_s9, 3072, %s217_s12, [#allocation4], %s289_s20, %s289_s20, %s290_s21  }
  0x9a   :  { %286 = dma.done.wait [#allocation4], 3072  }
  0x9b   :  { %287 = vsyncadd [#allocation4], 4294964224 }
  0x9c   :  { %227 = vsyncpa [#allocation3], 1 }
  0x9d   :  { %228 = vsyncpa [#allocation4], 1 }

</bundles_post_ra>
